<compile_context>
chip_gen: v7x
topology: tpu7x:2x2x1
jax: 0.10.0
libtpu: 0.0.40
codegen_flags: <defaults>
</compile_context>

<pallas_src>
import functools
import math
from typing import NamedTuple

import numpy as np

import jax
import jax.numpy as jnp
from jax.experimental import pallas as pl
from jax.experimental.pallas import tpu as pltpu


def _round_up(x, m):
    return ((x + m - 1) // m) * m


# ----------------------------------------------------------------------------
# Host-side (setup-time, numpy) construction of the sampling matrix S^T.
# Mirrors BEV2Pol.__init__ + F.grid_sample(bilinear, zeros, align_corners=True).
# ----------------------------------------------------------------------------
def _pixel_coords_np(bev_size, pol_size, max_range=50.0,
                     fov_phi=(-math.pi, math.pi),
                     range_xy=(-50.0, 50.0, -50.0, 50.0)):
    H_b, W_b = bev_size
    H_p, W_p = pol_size
    xmin, xmax, ymin, ymax = range_xy

    r_lin = np.linspace(0.0, max_range, H_p, dtype=np.float32).reshape(-1, 1)
    r_lin = np.tile(r_lin, (1, W_p))
    phi_lin = np.linspace(fov_phi[0], fov_phi[1], W_p, dtype=np.float32).reshape(1, -1)
    phi_lin = np.tile(phi_lin, (H_p, 1))

    x = r_lin * np.cos(phi_lin)
    y = r_lin * np.sin(phi_lin)
    x_pix = (x - xmin) / (xmax - xmin) * (W_b - 1)
    y_pix = (ymax - y) / (ymax - ymin) * (H_b - 1)

    # normalize / un-normalize round trip: grid build + grid_sample(align_corners=True)
    grid_x = 2.0 * x_pix / (W_b - 1) - 1.0
    grid_y = 2.0 * y_pix / (H_b - 1) - 1.0
    ix = (grid_x + 1.0) * 0.5 * (W_b - 1)   # sample column (float)
    iy = (grid_y + 1.0) * 0.5 * (H_b - 1)   # sample row    (float)
    return ix.astype(np.float32), iy.astype(np.float32)


def _corners_np(ix, iy, H_b, W_b):
    """Four bilinear corners: list of (flat BEV index, weight), zeros padding."""
    x0 = np.floor(ix); y0 = np.floor(iy)
    x1 = x0 + 1.0;     y1 = y0 + 1.0
    wx1 = ix - x0; wx0 = 1.0 - wx1
    wy1 = iy - y0; wy0 = 1.0 - wy1
    out = []
    for yc, xc, w in ((y0, x0, wy0 * wx0), (y0, x1, wy0 * wx1),
                      (y1, x0, wy1 * wx0), (y1, x1, wy1 * wx1)):
        valid = (xc >= 0) & (xc <= W_b - 1) & (yc >= 0) & (yc <= H_b - 1)
        xi = np.clip(xc.astype(np.int32), 0, W_b - 1)
        yi = np.clip(yc.astype(np.int32), 0, H_b - 1)
        out.append((yi * W_b + xi, (w * valid).astype(np.float32)))
    return out


def _sampling_matrix_T_np(bev_size, pol_size, **kwargs):
    """(K, N) = (H_b*W_b, H_p*W_p) bilinear interpolation matrix S^T (scatter build)."""
    H_b, W_b = bev_size
    ix, iy = _pixel_coords_np(bev_size, pol_size, **kwargs)
    ix = ix.reshape(-1); iy = iy.reshape(-1)
    N = ix.shape[0]
    K = H_b * W_b
    cols = np.arange(N)
    ST = np.zeros((K, N), dtype=np.float32)
    for rows, w in _corners_np(ix, iy, H_b, W_b):
        np.add.at(ST, (rows, cols), w)
    return ST


# ----------------------------------------------------------------------------
# Static plan (built once per module instance)
# ----------------------------------------------------------------------------
class _Cfg(NamedTuple):
    K: int
    N: int
    K_pad: int
    N_pad: int
    tn: int
    tk: int
    nnb: int
    max_nnz: int
    visited: int
    H_p: int
    W_p: int
    pin_a: str      # "auto" | "always" | "never"
    tm_max: int


class _Plan(NamedTuple):
    st: jax.Array    # (K_pad, N_pad) bf16 (streamed operand)
    kblk: jax.Array  # (nnb*max_nnz,) int32: per-N-block list of nonzero K blocks (SMEM)
    nnz: jax.Array   # (nnb,) int32: number of valid entries per kblk row (SMEM)
    cfg: _Cfg


def _build_plan(st_np, pol_size, tn, tk, pin_a, tm_max):
    K, N = st_np.shape
    H_p, W_p = pol_size

    # Lane-dense tiles (multiples of 128), clamped to the padded problem size.
    tn = _round_up(min(tn, _round_up(N, 128)), 128)
    tk = _round_up(min(tk, _round_up(K, 128)), 128)
    K_pad = _round_up(K, tk)
    N_pad = _round_up(N, tn)
    nkb = K_pad // tk
    nnb = N_pad // tn

    st_pad = np.zeros((K_pad, N_pad), dtype=np.float32)
    st_pad[:K, :N] = st_np

    # Block-sparsity structure of S^T: per N block, the K blocks with any nonzero weight.
    blk_nz = np.abs(st_pad).reshape(nkb, tk, nnb, tn).sum(axis=(1, 3)) > 0.0   # (nkb, nnb)
    nnz_np = blk_nz.sum(axis=0).astype(np.int32)                               # per N-block
    max_nnz = max(int(nnz_np.max()), 1)
    kblk_np = np.zeros((nnb, max_nnz), dtype=np.int32)
    for jb in range(nnb):
        ids = np.nonzero(blk_nz[:, jb])[0].astype(np.int32)
        if jb % 2 == 1:
            ids = ids[::-1]    # serpentine: share block indices across j boundaries
        if ids.size:
            kblk_np[jb, :ids.size] = ids
            kblk_np[jb, ids.size:] = ids[-1]   # padded slots repeat a valid index
    visited = max(int(nnz_np.sum()), 1)
    # TODO(synk): on v7x (2 TensorCores) interleave the N blocks by nnz so both cores
    # see a balanced visited-tile count when the parallel axis is sharded.

    cfg = _Cfg(K=K, N=N, K_pad=K_pad, N_pad=N_pad, tn=tn, tk=tk, nnb=nnb,
               max_nnz=max_nnz, visited=visited, H_p=H_p, W_p=W_p,
               pin_a=pin_a, tm_max=tm_max)
    return _Plan(st=jnp.asarray(st_pad).astype(jnp.bfloat16),
                 kblk=jnp.asarray(kblk_np.reshape(-1)),
                 nnz=jnp.asarray(nnz_np),
                 cfg=cfg)


# ----------------------------------------------------------------------------
# Pallas kernel: block-sparse tiled  O = A @ S^T  on the MXU
# ----------------------------------------------------------------------------
def _make_kernel(*, pinned, use_scratch, tk, max_nnz, k_axis):
    def kernel(kblk_ref, nnz_ref, a_ref, st_ref, o_ref, *scratch):
        j = pl.program_id(0)            # N (output pixel) block — parallel
        k = pl.program_id(k_axis)       # visited K-block slot (via scalar prefetch)
        # f32 outputs accumulate directly into the resident output block; bf16
        # outputs go through an f32 scratch and are cast once at the end.
        acc_ref = scratch[0] if use_scratch else o_ref

        @pl.when(k == 0)
        def _init():
            acc_ref[...] = jnp.zeros_like(acc_ref)

        @pl.when(k < nnz_ref[j])        # skip padded / all-zero K blocks of S^T
        def _accum():
            if pinned:
                # A is fully resident in VMEM; slice the visited K block locally.
                kb = kblk_ref[j * max_nnz + k]
                start = pl.multiple_of(kb * tk, tk)
                a_tile = a_ref[:, pl.ds(start, tk)]
            else:
                a_tile = a_ref[...]
            acc_ref[...] += jnp.dot(a_tile, st_ref[...],
                                    preferred_element_type=jnp.float32)

        if use_scratch:
            @pl.when(k == pl.num_programs(k_axis) - 1)
            def _finalize():
                o_ref[...] = acc_ref[...].astype(o_ref.dtype)

    return kernel


@functools.partial(jax.jit, static_argnames=("cfg",))
def _bev2pol_apply(bev_feat, st, kblk, nnz, cfg: _Cfg):
    B, C, H_b, W_b = bev_feat.shape
    assert H_b * W_b == cfg.K, (bev_feat.shape, cfg.K)
    M = B * C
    out_dtype = bev_feat.dtype
    osize = jnp.dtype(out_dtype).itemsize
    use_scratch = bool(jnp.dtype(out_dtype) != jnp.dtype(jnp.float32))

    # M tiling (tm <= tm_max, multiple of 8) so large B*C fits v7x's 64 MiB VMEM.
    tm = min(_round_up(M, 8), cfg.tm_max)
    M_pad = _round_up(M, tm)
    nmb = M_pad // tm

    # Pin the entire A operand resident in VMEM when it (double-buffered) is small;
    # otherwise stream (tm, tk) blocks of A keyed by the same kblk table as S^T.
    pin = (cfg.pin_a == "always") or (
        cfg.pin_a == "auto" and 2 * M_pad * cfg.K_pad * 2 <= (8 << 20))

    # Pad + bf16 cast of A happen inside this jitted wrapper (fused, no extra passes).
    a = bev_feat.reshape(M, cfg.K)
    if M_pad != M or cfg.K_pad != cfg.K:
        a = jnp.pad(a, ((0, M_pad - M), (0, cfg.K_pad - cfg.K)))
    a = a.astype(jnp.bfloat16)

    tn, tk, max_nnz = cfg.tn, cfg.tk, cfg.max_nnz

    if pin:
        grid = (cfg.nnb, max_nnz)                    # N outer (parallel), K inner
        k_axis = 1
        a_spec = pl.BlockSpec((M_pad, cfg.K_pad), lambda j, k, kb, nn: (0, 0))
        st_spec = pl.BlockSpec((tk, tn),
                               lambda j, k, kb, nn: (kb[j * max_nnz + k], j))
        o_spec = pl.BlockSpec((M_pad, tn), lambda j, k, kb, nn: (0, j))
        o_rows = M_pad
        semantics = ("parallel", "arbitrary")
        vmem_needed = 2 * (M_pad * cfg.K_pad * 2 + tk * tn * 2 + M_pad * tn * osize)
        bytes_accessed = (M_pad * cfg.K_pad * 2 + cfg.visited * tk * tn * 2
                          + M_pad * cfg.N_pad * osize)
    else:
        grid = (cfg.nnb, nmb, max_nnz)               # N outer, M middle, K inner
        k_axis = 2
        a_spec = pl.BlockSpec((tm, tk),
                              lambda j, m, k, kb, nn: (m, kb[j * max_nnz + k]))
        st_spec = pl.BlockSpec((tk, tn),
                               lambda j, m, k, kb, nn: (kb[j * max_nnz + k], j))
        o_spec = pl.BlockSpec((tm, tn), lambda j, m, k, kb, nn: (m, j))
        o_rows = tm
        semantics = ("parallel", "parallel", "arbitrary")
        vmem_needed = 2 * (tm * tk * 2 + tk * tn * 2 + tm * tn * osize)
        bytes_accessed = (cfg.visited * nmb * (tm * tk + tk * tn) * 2
                          + M_pad * cfg.N_pad * osize)

    scratch_shapes = []
    if use_scratch:
        scratch_shapes.append(pltpu.VMEM((o_rows, tn), jnp.float32))
        vmem_needed += o_rows * tn * 4

    # Scoped-VMEM limit from the actual tile footprint; clamp to 64 MiB (v7x-safe).
    vmem_limit = int(min(max(32 << 20, vmem_needed + (4 << 20)), 64 << 20))
    cost = pl.CostEstimate(flops=int(2 * M_pad * tk * tn * cfg.visited),
                           transcendentals=0,
                           bytes_accessed=int(bytes_accessed))

    kernel = _make_kernel(pinned=pin, use_scratch=use_scratch, tk=tk,
                          max_nnz=max_nnz, k_axis=k_axis)

    out = pl.pallas_call(
        kernel,
        out_shape=jax.ShapeDtypeStruct((M_pad, cfg.N_pad), out_dtype),
        grid_spec=pltpu.PrefetchScalarGridSpec(
            num_scalar_prefetch=2,
            grid=grid,
            in_specs=[a_spec, st_spec],
            out_specs=o_spec,
            scratch_shapes=scratch_shapes),
        compiler_params=pltpu.CompilerParams(
            dimension_semantics=semantics,
            vmem_limit_bytes=vmem_limit),
        cost_estimate=cost,
    )(kblk, nnz, a, st)

    if M_pad != M or cfg.N_pad != cfg.N:
        out = out[:M, :cfg.N]
    return out.reshape(B, C, cfg.H_p, cfg.W_p)


# ----------------------------------------------------------------------------
# Module-like wrapper (all analysis in __init__, jitted forward in __call__)
# ----------------------------------------------------------------------------
class BEV2Pol:
    """BEV -> Polar view transform (== F.grid_sample bilinear/zeros/align_corners=True).

    Tile defaults (tn=tk=512) are a solid middle ground; per-generation sweeps:
      * v5e (HBM-bound):        tk=256, tn=512
      * v7x (overhead-bound):   tn=1024, tk=512 (re-check the 64 MiB VMEM budget)
    For good MXU row utilization batch B*C >= 256 (v6e/v7x) / 128 (v5e) per call.
    """

    def __init__(self, bev_size, pol_size, max_range=50.0,
                 fov_phi=(-math.pi, math.pi),
                 range_xy=(-50.0, 50.0, -50.0, 50.0),
                 tn=512, tk=512, tm=256, pin_a="auto"):
        st_np = _sampling_matrix_T_np(tuple(bev_size), tuple(pol_size),
                                      max_range=max_range, fov_phi=fov_phi,
                                      range_xy=range_xy)
        self.bev_size = tuple(bev_size)
        self.pol_size = tuple(pol_size)
        self._plan = _build_plan(st_np, self.pol_size, tn, tk, pin_a, tm)

    def __call__(self, bev_feat):
        p = self._plan
        return _bev2pol_apply(bev_feat, p.st, p.kblk, p.nnz, p.cfg)


# ----------------------------------------------------------------------------
# Exact f32 bilinear grid_sample reference (numpy; validation only)
# ----------------------------------------------------------------------------
def grid_sample_bilinear_ref_np(bev_feat_np, pol_size, **kwargs):
    B, C, H_b, W_b = bev_feat_np.shape
    H_p, W_p = pol_size
    ix, iy = _pixel_coords_np((H_b, W_b), pol_size, **kwargs)
    ixf = ix.reshape(-1); iyf = iy.reshape(-1)
    flat = bev_feat_np.reshape(B, C, H_b * W_b).astype(np.float32)
    out = np.zeros((B, C, ixf.shape[0]), dtype=np.float32)
    for idx, w in _corners_np(ixf, iyf, H_b, W_b):
        out += flat[:, :, idx] * w[None, None, :]
    return out.reshape(B, C, H_p, W_p)


# ----------------------------------------------------------------------------
if __name__ == "__main__":
    B, C = 2, 4
    bev_size = (16, 16)   # (H_b, W_b)
    pol_size = (16, 16)   # (H_p, W_p)

    key = jax.random.PRNGKey(0)
    bev_feat = jax.random.normal(key, (B, C, *bev_size), dtype=jnp.float32)

    ref = jnp.asarray(grid_sample_bilinear_ref_np(np.asarray(jax.device_get(bev_feat)),
                                                  pol_size))

    # 1) Default config: wide lane-dense tile, auto-pins A fully in VMEM (tiny M).
    mod = BEV2Pol(bev_size, pol_size)
    out = jax.block_until_ready(mod(bev_feat))
    assert out.shape == (B, C, *pol_size)
    err = float(jnp.max(jnp.abs(out.astype(jnp.float32) - ref)))
    assert err < 7.5e-2, err   # bf16 weight/feature quantization bound

    # 2) Small tiles + forced streaming: exercises the block-sparse, K-accumulating,
    #    M-tiled path with direct accumulation into the resident f32 output block.
    mod2 = BEV2Pol(bev_size, pol_size, tn=128, tk=128, pin_a="never")
    out2 = jax.block_until_ready(mod2(bev_feat))
    err2 = float(jnp.max(jnp.abs(out2.astype(jnp.float32) - ref)))
    assert err2 < 7.5e-2, err2

    # 3) bf16 features/output: exercises the f32 scratch-accumulator + cast path.
    out3 = jax.block_until_ready(mod(bev_feat.astype(jnp.bfloat16)))
    err3 = float(jnp.max(jnp.abs(out3.astype(jnp.float32) - ref)))
    assert err3 < 1.5e-1, err3

    print("KERNEL_OK")
</pallas_src>

<mosaic_0001>
module attributes {stable_mosaic.version = 11 : i64} {
  func.func @kernel(%arg0: i32, %arg1: i32, %arg2: memref<1xi32, #tpu.memory_space<smem>>, %arg3: memref<1xi32, #tpu.memory_space<smem>>, %arg4: memref<8x256xbf16, #tpu.memory_space<vmem>>, %arg5: memref<256x256xbf16, #tpu.memory_space<vmem>>, %arg6: memref<8x256xf32, #tpu.memory_space<vmem>>) attributes {dimension_semantics = [#tpu.dimension_semantics<parallel>, #tpu.dimension_semantics<arbitrary>], iteration_bounds = array<i64: 1, 1>, scalar_prefetch = 2 : i64, scratch_operands = 0 : i64, tpu.core_type = #tpu.core_type<tc>, window_params = [{pipeline_mode = #tpu.pipeline_mode<synchronous>, transform_indices = @transform_0, window_bounds = array<i64: 8, 256>}, {transform_indices = @transform_1, window_bounds = array<i64: 256, 256>}, {transform_indices = @transform_2, window_bounds = array<i64: 8, 256>}]} {
    %c0_i32 = arith.constant 0 : i32
    %0 = arith.cmpi eq, %arg1, %c0_i32 : i32
    %1 = arith.extui %0 : i1 to i32
    %c0_i32_0 = arith.constant 0 : i32
    %2 = arith.cmpi ne, %1, %c0_i32_0 : i32
    scf.if %2 {
      %cst = arith.constant 0.000000e+00 : f32
      %8 = vector.broadcast %cst : f32 to vector<8x256xf32>
      %c0 = arith.constant 0 : index
      %c0_2 = arith.constant 0 : index
      %9 = vector.load %arg6[%c0, %c0_2] : memref<8x256xf32, #tpu.memory_space<vmem>>, vector<8x256xf32>
      tpu.vector_store %arg6[%c0, %c0_2], %8 {strides = array<i32>} : memref<8x256xf32, #tpu.memory_space<vmem>>, vector<8x256xf32>,
    } else {
    }
    %3 = arith.index_cast %arg0 : i32 to index
    %4 = memref.load %arg3[%3] : memref<1xi32, #tpu.memory_space<smem>>
    %5 = arith.cmpi slt, %arg1, %4 : i32
    %6 = arith.extui %5 : i1 to i32
    %c0_i32_1 = arith.constant 0 : i32
    %7 = arith.cmpi ne, %6, %c0_i32_1 : i32
    scf.if %7 {
      %c1_i32 = arith.constant 1 : i32
      %8 = arith.muli %arg0, %c1_i32 : i32
      %9 = arith.addi %8, %arg1 : i32
      %10 = arith.index_cast %9 : i32 to index
      %11 = memref.load %arg2[%10] : memref<1xi32, #tpu.memory_space<smem>>
      %c256_i32 = arith.constant 256 : i32
      %12 = arith.muli %11, %c256_i32 : i32
      %13 = tpu.assume_multiple %12, 256 : i32
      %c0 = arith.constant 0 : index
      %14 = arith.index_cast %13 : i32 to index
      %15 = vector.load %arg4[%c0, %14] : memref<8x256xbf16, #tpu.memory_space<vmem>>, vector<8x256xbf16>
      %c0_2 = arith.constant 0 : index
      %c0_3 = arith.constant 0 : index
      %16 = vector.load %arg6[%c0_2, %c0_3] : memref<8x256xf32, #tpu.memory_space<vmem>>, vector<8x256xf32>
      %c0_4 = arith.constant 0 : index
      %c0_5 = arith.constant 0 : index
      %17 = vector.load %arg5[%c0_4, %c0_5] : memref<256x256xbf16, #tpu.memory_space<vmem>>, vector<256x256xbf16>
      %cst = arith.constant dense<0.000000e+00> : vector<8x256xf32>
      %18 = tpu.matmul %15, %17, %cst {dimension_numbers = #tpu.dot_dimension_numbers<[1], [0], [0], [1], [0, 0, 1, 1], [], []>} : vector<8x256xbf16>, vector<256x256xbf16>, vector<8x256xf32> -> vector<8x256xf32>
      %19 = arith.addf %16, %18 : vector<8x256xf32>
      %c0_6 = arith.constant 0 : index
      %c0_7 = arith.constant 0 : index
      %20 = vector.load %arg6[%c0_6, %c0_7] : memref<8x256xf32, #tpu.memory_space<vmem>>, vector<8x256xf32>
      tpu.vector_store %arg6[%c0_6, %c0_7], %19 {strides = array<i32>} : memref<8x256xf32, #tpu.memory_space<vmem>>, vector<8x256xf32>,
    } else {
    }
    return
  }
  func.func @transform_0(%arg0: i32, %arg1: i32, %arg2: memref<1xi32, #tpu.memory_space<smem>>, %arg3: memref<1xi32, #tpu.memory_space<smem>>) -> (i32, i32) {
    %c0_i32 = arith.constant 0 : i32
    %c0_i32_0 = arith.constant 0 : i32
    %c0_i32_1 = arith.constant 0 : i32
    return %c0_i32, %c0_i32_0 : i32, i32
  }
  func.func @transform_1(%arg0: i32, %arg1: i32, %arg2: memref<1xi32, #tpu.memory_space<smem>>, %arg3: memref<1xi32, #tpu.memory_space<smem>>) -> (i32, i32) {
    %c1_i32 = arith.constant 1 : i32
    %0 = arith.muli %arg0, %c1_i32 : i32
    %1 = arith.addi %0, %arg1 : i32
    %2 = arith.index_cast %1 : i32 to index
    %3 = memref.load %arg2[%2] : memref<1xi32, #tpu.memory_space<smem>>
    %c0_i32 = arith.constant 0 : i32
    return %3, %arg0 : i32, i32
  }
  func.func @transform_2(%arg0: i32, %arg1: i32, %arg2: memref<1xi32, #tpu.memory_space<smem>>, %arg3: memref<1xi32, #tpu.memory_space<smem>>) -> (i32, i32) {
    %c0_i32 = arith.constant 0 : i32
    %c0_i32_0 = arith.constant 0 : i32
    return %c0_i32, %arg0 : i32, i32
  }
}

</mosaic_0001>

<bundles_post_ra>
// kernel: _bev2pol_apply.1
= control target key start
LH: loop header
LB: loop body
LE: loop exit
PB: predicated region body
PF: predicated region fallthrough
CT: control target
= control target key end

     0   :  { %v415_v0 = vmov 0.0   ;;  %s508_s0 = inlined_call_operand.<no memory space> [shape: s32[1], index: 0, kind: input, shape index: {}]   ;;  %s509_s1 = inlined_call_operand.<no memory space> [shape: s32[1], index: 1, kind: input, shape index: {}]   ;;  %s510_s2 = inlined_call_operand.vmem [shape: bf16[8,256], index: 2, kind: input, shape index: {}]   ;;  %s511_s4 = inlined_call_operand.vmem [shape: f32[8,256], index: 4, kind: output, shape index: {}]   ;;  %s512_s3 = inlined_call_operand.vmem [shape: bf16[256,256], index: 3, kind: input, shape index: {}]  }
   0x1   :  { %9 = sst [smem:[#allocation3]] %s508_s0  ;;  %s322_s19 = sshll.u32 %s508_s0, 5  ;;  %49 = vst [vmem:[%s511_s4] sm:$0xff] %v415_v0  ;;  %50 = vst [vmem:[%s511_s4 + $0x8] sm:$0xff] %v415_v0 }
   0x2   :  { %p37_p0 = scmp.lt.s32.totalorder %s322_s19, 31  ;;  %p326_p1 = scmp.le.s32.totalorder %s509_s1, 0 }
   0x3   :  { %s57_s0 = sld [smem:[#allocation3]] (!%p326_p1) }
   0x4   :  { %s514_s19 = smov (!%p37_p0, %s322_s19), 31  ;;  %55 = sbr.rel (%p326_p1) target bundleno = 288 (0x120), region = 17 }
   0x5   :  { %s363_s24 = sshll.u32 %s514_s19, 3 }
   0x6   :  { %s456_s27 = scalar_lea.vmem %s512_s3, %s363_s24 }
   0x7   :  { %v365_v1 = vld [vmem:[%s456_s27 + $0x4] ss:$8 sps:$4 sm:$0xff] (!%p326_p1)   ;;  %v367_v2 = vld [vmem:[%s456_s27] ss:$8 sps:$4 sm:$0xff] (!%p326_p1)   ;;  %v368_v3 = vld [vmem:[%s456_s27 + $0x14] ss:$8 sps:$4 sm:$0xff] (!%p326_p1)  }
   0x8   :  { %265 = vmatprep.subr.bf16.mxu0 (!%p326_p1), %v365_v1  ;;  %v370_v4 = vld [vmem:[%s456_s27 + $0x10] ss:$8 sps:$4 sm:$0xff] (!%p326_p1)   ;;  %v371_v5 = vld [vmem:[%s456_s27 + $0x24] ss:$8 sps:$4 sm:$0xff] (!%p326_p1)   ;;  %v373_v6 = vld [vmem:[%s456_s27 + $0x20] ss:$8 sps:$4 sm:$0xff] (!%p326_p1)  }
   0x9   :  { %266 = vmatpush1.bf16.msra.mxu0 (!%p326_p1), %v367_v2  ;;  %v374_v7 = vld [vmem:[%s456_s27 + $0x34] ss:$8 sps:$4 sm:$0xff] (!%p326_p1)   ;;  %s327_s1 = sshll.u32 (!%p326_p1), %s57_s0, 8  ;;  %v376_v8 = vld [vmem:[%s456_s27 + $0x30] ss:$8 sps:$4 sm:$0xff] (!%p326_p1)   ;;  %v64_v36 = vld [vmem:[%s511_s4] sm:$0xff] (!%p326_p1) }
   0xa   :  { %267 = vmatprep.subr.bf16.mxu0 (!%p326_p1), %v368_v3  ;;  %v377_v9 = vld [vmem:[%s456_s27 + $0x44] ss:$8 sps:$4 sm:$0xff] (!%p326_p1)   ;;  %s59_s3 = sshra.s32 (!%p326_p1), %s327_s1, 7  ;;  %v379_v10 = vld [vmem:[%s456_s27 + $0x40] ss:$8 sps:$4 sm:$0xff] (!%p326_p1)  }
   0xb   :  { %s328_s30 = sshll.u32 %s59_s3, 2  ;;  %v380_v11 = vld [vmem:[%s456_s27 + $0x54] ss:$8 sps:$4 sm:$0xff]   ;;  %v382_v12 = vld [vmem:[%s456_s27 + $0x50] ss:$8 sps:$4 sm:$0xff]   ;;  %v65_v37 = vld [vmem:[%s511_s4 + $0x8] sm:$0xff] }
   0xc   :  { %s62_s7 = scalar_lea.vmem %s510_s2, %s328_s30  ;;  %v383_v13 = vld [vmem:[%s456_s27 + $0x64] ss:$8 sps:$4 sm:$0xff]   ;;  %v385_v16 = vld [vmem:[%s456_s27 + $0x60] ss:$8 sps:$4 sm:$0xff]   ;;  %v386_v17 = vld [vmem:[%s456_s27 + $0x74] ss:$8 sps:$4 sm:$0xff]  }
   0xd   :  { %268 = vmatpush1.bf16.msra.mxu0 %v370_v4  ;;  %v63_v14 = vld [vmem:[%s62_s7] sm:$0xff]  ;;  %v388_v18 = vld [vmem:[%s456_s27 + $0x70] ss:$8 sps:$4 sm:$0xff]   ;;  %v392_v21 = vld [vmem:[%s456_s27 + $0x94] ss:$8 sps:$4 sm:$0xff]  }
   0xe   :  { %269 = vmatprep.subr.bf16.mxu0 %v371_v5  ;;  %v330_v15 = vcombine.high %v63_v14, %v63_v14  ;;  %v389_v19 = vld [vmem:[%s456_s27 + $0x84] ss:$8 sps:$4 sm:$0xff]   ;;  %v391_v20 = vld [vmem:[%s456_s27 + $0x80] ss:$8 sps:$4 sm:$0xff]   ;;  %v394_v22 = vld [vmem:[%s456_s27 + $0x90] ss:$8 sps:$4 sm:$0xff]   ;;  %v329_v35 = vcombine.low %v63_v14, %v63_v14 }
   0xf   :  { %v395_v23 = vld [vmem:[%s456_s27 + $0xa4] ss:$8 sps:$4 sm:$0xff]   ;;  %v397_v24 = vld [vmem:[%s456_s27 + $0xa0] ss:$8 sps:$4 sm:$0xff]   ;;  %v398_v25 = vld [vmem:[%s456_s27 + $0xb4] ss:$8 sps:$4 sm:$0xff]  }
  0x10   :  { %297 = vmatprep.mubr.bf16.mxu0 %v330_v15  ;;  %v400_v26 = vld [vmem:[%s456_s27 + $0xb0] ss:$8 sps:$4 sm:$0xff]   ;;  %v401_v27 = vld [vmem:[%s456_s27 + $0xc4] ss:$8 sps:$4 sm:$0xff]   ;;  %v403_v28 = vld [vmem:[%s456_s27 + $0xc0] ss:$8 sps:$4 sm:$0xff]  }
  0x11   :  { %270 = vmatpush1.bf16.msra.mxu0 %v373_v6  ;;  %v404_v29 = vld [vmem:[%s456_s27 + $0xd4] ss:$8 sps:$4 sm:$0xff]   ;;  %v406_v30 = vld [vmem:[%s456_s27 + $0xd0] ss:$8 sps:$4 sm:$0xff]   ;;  %v407_v31 = vld [vmem:[%s456_s27 + $0xe4] ss:$8 sps:$4 sm:$0xff]  }
  0x12   :  { %271 = vmatprep.subr.bf16.mxu0 %v374_v7  ;;  %v409_v32 = vld [vmem:[%s456_s27 + $0xe0] ss:$8 sps:$4 sm:$0xff]   ;;  %v410_v33 = vld [vmem:[%s456_s27 + $0xf4] ss:$8 sps:$4 sm:$0xff]   ;;  %v412_v34 = vld [vmem:[%s456_s27 + $0xf0] ss:$8 sps:$4 sm:$0xff]  }
  0x15   :  { %272 = vmatpush1.bf16.msra.mxu0 %v376_v8 }
  0x16   :  { %273 = vmatprep.subr.bf16.mxu0 %v377_v9 }
  0x19   :  { %274 = vmatpush1.bf16.msra.mxu0 %v379_v10 }
  0x1a   :  { %275 = vmatprep.subr.bf16.mxu0 %v380_v11 }
  0x1d   :  { %276 = vmatpush1.bf16.msra.mxu0 %v382_v12 }
  0x1e   :  { %277 = vmatprep.subr.bf16.mxu0 %v383_v13 }
  0x21   :  { %278 = vmatpush1.bf16.msra.mxu0 %v385_v16 }
  0x22   :  { %279 = vmatprep.subr.bf16.mxu0 %v386_v17 }
  0x25   :  { %280 = vmatpush1.bf16.msra.mxu0 %v388_v18 }
  0x26   :  { %281 = vmatprep.subr.bf16.mxu0 %v389_v19 }
  0x29   :  { %282 = vmatpush1.bf16.msra.mxu0 %v391_v20 }
  0x2a   :  { %283 = vmatprep.subr.bf16.mxu0 %v392_v21 }
  0x2d   :  { %284 = vmatpush1.bf16.msra.mxu0 %v394_v22 }
  0x2e   :  { %285 = vmatprep.subr.bf16.mxu0 %v395_v23 }
  0x31   :  { %286 = vmatpush1.bf16.msra.mxu0 %v397_v24 }
  0x32   :  { %287 = vmatprep.subr.bf16.mxu0 %v398_v25 }
  0x35   :  { %288 = vmatpush1.bf16.msra.mxu0 %v400_v26 }
  0x36   :  { %289 = vmatprep.subr.bf16.mxu0 %v401_v27 }
  0x39   :  { %290 = vmatpush1.bf16.msra.mxu0 %v403_v28 }
  0x3a   :  { %291 = vmatprep.subr.bf16.mxu0 %v404_v29 }
  0x3d   :  { %292 = vmatpush1.bf16.msra.mxu0 %v406_v30 }
  0x3e   :  { %293 = vmatprep.subr.bf16.mxu0 %v407_v31 }
  0x41   :  { %294 = vmatpush1.bf16.msra.mxu0 %v409_v32 }
  0x42   :  { %295 = vmatprep.subr.bf16.mxu0 %v410_v33 }
  0x45   :  { %296 = vmatpush1.bf16.msra.mxu0 %v412_v34 }
  0x48   :  { %298 = vmatmul.mubr.bf16.vlgmr.msra.gmra.mrb[0].mxu0 %v329_v35 }
 0x11b   :  { %v299_v38 = vpop.f32.mrb[0].mxu0 }
 0x11c   :  { %v306_v39 = vadd.f32 %v299_v38, %v64_v36  ;;  %v301_v40 = vpop.f32.mrb[1].mxu0 }
 0x11d   :  { %v307_v41 = vadd.f32 %v301_v40, %v65_v37  ;;  %v303_v42 = vpop.f32.mrb[2].mxu0 }
 0x11e   :  { %308 = vst [vmem:[%s511_s4] sm:$0xff] %v306_v39  ;;  %v304_v43 = vpop.f32.mrb[3].mxu0 }
 0x11f   :  { %309 = vst [vmem:[%s511_s4 + $0x8] sm:$0xff] %v307_v41 }
 0x120 PF:  {}

</bundles_post_ra>
